<compile_context>
chip_gen: v7x
topology: tpu7x:2x2x1
jax: 0.10.0
libtpu: 0.0.40
codegen_flags: <defaults>
</compile_context>

<pallas_src>
import functools

import jax
import jax.numpy as jnp
from jax import lax
from jax.experimental import pallas as pl
from jax.experimental.pallas import tpu as pltpu


def _round_up(n, m):
    return ((n + m - 1) // m) * m


def _mask_glu_conv_kernel(x_ref, xh_ref, w1_ref, w2_ref, b2_ref,
                          out_ref, xw_ref, *, k, dilation, halo_pad):
    """One (batch, time-tile) step: causal conv taps -> GLU -> 1x1 conv."""
    block_t = x_ref.shape[1]
    c_pad = x_ref.shape[2]
    halo = dilation * (k - 1)
    pad0 = halo_pad - halo            # real halo rows live at [pad0, halo_pad)

    # Assemble the bf16 window once per step (this is also the f32->bf16 cast):
    #   rows [0, halo_pad)              left context (wrapper supplies zeros at t==0)
    #   rows [halo_pad, halo_pad+blk)   fresh input rows (sublane-aligned offset)
    xw_ref[pl.ds(0, halo_pad), :] = xh_ref[0, 0].astype(jnp.bfloat16)
    xw_ref[pl.ds(halo_pad, block_t), :] = x_ref[0].astype(jnp.bfloat16)

    # Dilated causal conv with merged GLU halves: k matmuls of
    # (block_t, C_pad) x (C_pad, 2*C_pad), f32 accumulation on the MXU.
    y = jnp.dot(xw_ref[pl.ds(pad0, block_t), :], w1_ref[0],
                preferred_element_type=jnp.float32)
    for j in range(1, k):                                 # k is small and static
        xj = xw_ref[pl.ds(pad0 + j * dilation, block_t), :]
        y = y + jnp.dot(xj, w1_ref[j], preferred_element_type=jnp.float32)

    # GLU split at a lane-tile boundary (c_pad is a multiple of 128).
    a = y[:, :c_pad]
    b = y[:, c_pad:]
    g = a * jax.nn.sigmoid(b)

    # 1x1 conv + bias (bf16 MXU, f32 accumulation, f32 bias add).
    out = jnp.dot(g.astype(jnp.bfloat16), w2_ref[...],
                  preferred_element_type=jnp.float32) + b2_ref[...]
    out_ref[0] = out.astype(out_ref.dtype)


def mask_gate_linear_unit_conv(x, conv1_weight, conv2_weight, conv2_bias,
                               *, k=3, dilation=1, block_t=None):
    """Fused Pallas forward of MaskGateLinearUnitConv.

    x:            (B, T, C) float32
    conv1_weight: (2*C, C, k)   torch Conv1d layout, bias=False
    conv2_weight: (C, C, 1)     torch Conv1d layout
    conv2_bias:   (C,)
    returns       (B, T, C)
    """
    B, T, C = x.shape
    padding = 2 * (dilation - 1) + (k - 1)
    halo = dilation * (k - 1)
    # k == 3 (module default) or dilation == 1 -> masked conv == causal conv of length T.
    assert padding == halo, "kernel supports k == 3 or dilation == 1"
    assert conv1_weight.shape == (2 * C, C, k)
    assert conv2_weight.shape == (C, C, 1)
    assert conv2_bias.shape == (C,)

    C_pad = _round_up(C, 128)                 # lane-dense activations / stores
    halo_pad = _round_up(max(halo, 8), 8)     # sublane-aligned window offset

    if block_t is None:
        block_t = 512                         # amortize per-grid-step overhead
    block_t = max(8, _round_up(block_t, 8))
    block_t = min(block_t, _round_up(T, 8))

    t_tiles = pl.cdiv(T, block_t)
    t_pad = t_tiles * block_t

    # --- activations: pad time (causal conv -> padded tail never affects the
    # first T outputs) and channels (zero channels contribute nothing). ---
    xp = x
    if t_pad != T:
        xp = jnp.pad(xp, ((0, 0), (0, t_pad - T), (0, 0)))
    if C_pad != C:
        xp = jnp.pad(xp, ((0, 0), (0, 0), (0, C_pad - C)))

    # Per-tile causal halo slab (zeros for the first tile), gathered by global
    # row index so it is correct for any block_t.  Shape (B, t_tiles, halo_pad, C_pad)
    # with the real rows placed at [halo_pad - halo, halo_pad).
    xq = jnp.pad(xp, ((0, 0), (halo, 0), (0, 0)))
    idx = jnp.arange(t_tiles)[:, None] * block_t + jnp.arange(halo)[None, :]
    x_halo = xq[:, idx, :]                                   # (B, t_tiles, halo, C_pad)
    x_halo = jnp.pad(x_halo, ((0, 0), (0, 0), (halo_pad - halo, 0), (0, 0)))

    # --- weights: bf16, merged GLU halves, channel-padded, row-major x @ W. ---
    w1_t = jnp.transpose(conv1_weight, (2, 1, 0))            # (k, C_in, 2C_out)
    wpad = ((0, 0), (0, C_pad - C), (0, C_pad - C))
    w1_lin = jnp.pad(w1_t[:, :, :C], wpad)                   # GLU linear half
    w1_gate = jnp.pad(w1_t[:, :, C:], wpad)                  # GLU gate half
    w1 = jnp.concatenate([w1_lin, w1_gate], axis=-1).astype(jnp.bfloat16)  # (k, C_pad, 2C_pad)
    w2 = jnp.pad(jnp.transpose(conv2_weight[:, :, 0], (1, 0)),
                 ((0, C_pad - C), (0, C_pad - C))).astype(jnp.bfloat16)    # (C_pad, C_pad)
    b2 = jnp.pad(conv2_bias, (0, C_pad - C)).astype(jnp.float32).reshape(1, C_pad)

    kernel = functools.partial(_mask_glu_conv_kernel,
                               k=k, dilation=dilation, halo_pad=halo_pad)

    # Advisory cost estimate.
    flops = 2 * B * t_pad * (k * C_pad * 2 * C_pad + C_pad * C_pad) + 4 * B * t_pad * C_pad
    bytes_accessed = (4 * B * t_pad * C_pad * 2 + 4 * B * t_tiles * halo_pad * C_pad
                      + 2 * (k * C_pad * 2 * C_pad + C_pad * C_pad) + 4 * C_pad)
    cost = pl.CostEstimate(flops=flops, transcendentals=B * t_pad * C_pad,
                           bytes_accessed=bytes_accessed)

    # Explicit VMEM budget (weights are double-buffered even with a constant
    # index_map, plus x/out tiles, the bf16 window scratch and f32 temporaries).
    w_bytes = (k * C_pad * 2 * C_pad + C_pad * C_pad) * 2 + C_pad * 4
    act_bytes = 2 * (block_t * C_pad * 4) * 2 + 2 * halo_pad * C_pad * 4
    scratch_bytes = (halo_pad + block_t) * C_pad * 2
    temp_bytes = 8 * block_t * C_pad * 4
    vmem_need = 2 * w_bytes + act_bytes + scratch_bytes + temp_bytes
    vmem_limit = int(min(64 * 1024 * 1024, max(32 * 1024 * 1024, 2 * vmem_need)))

    out = pl.pallas_call(
        kernel,
        out_shape=jax.ShapeDtypeStruct((B, t_pad, C_pad), x.dtype),
        grid_spec=pltpu.PrefetchScalarGridSpec(
            num_scalar_prefetch=0,
            grid=(B, t_tiles),
            in_specs=[
                pl.BlockSpec((1, block_t, C_pad), lambda b, t: (b, t, 0)),       # x tile
                pl.BlockSpec((1, 1, halo_pad, C_pad), lambda b, t: (b, t, 0, 0)),  # halo slab
                pl.BlockSpec((k, C_pad, 2 * C_pad), lambda b, t: (0, 0, 0)),      # W1 (GLU merged)
                pl.BlockSpec((C_pad, C_pad), lambda b, t: (0, 0)),                # W2 (1x1 conv)
                pl.BlockSpec((1, C_pad), lambda b, t: (0, 0)),                    # bias2
            ],
            out_specs=pl.BlockSpec((1, block_t, C_pad), lambda b, t: (b, t, 0)),
            scratch_shapes=[pltpu.VMEM((halo_pad + block_t, C_pad), jnp.bfloat16)],
        ),
        compiler_params=pltpu.CompilerParams(
            # No cross-step state: both batch and time tiles are independent,
            # so both axes can be sharded across TensorCores (v7x megacore).
            dimension_semantics=("parallel", "parallel"),
            vmem_limit_bytes=vmem_limit,
        ),
        cost_estimate=cost,
    )(xp, x_halo, w1, w2, b2)

    return out[:, :T, :C]


def _reference(x, conv1_weight, conv2_weight, conv2_bias, k, dilation):
    """Pure-JAX f32 replica of the PyTorch module forward."""
    B, T, C = x.shape
    P = 2 * (dilation - 1) + (k - 1)
    xt = jnp.transpose(x, (0, 2, 1))                         # (B, C, T)
    y = lax.conv_general_dilated(
        xt, conv1_weight.astype(jnp.float32),
        window_strides=(1,), padding=[(P, P)], rhs_dilation=(dilation,),
        dimension_numbers=("NCH", "OIH", "NCH"))
    y = y[:, :, :y.shape[2] - P]                             # masked conv slice
    y = jnp.transpose(y, (0, 2, 1))                          # (B, T, 2C)
    a, b = y[..., :C], y[..., C:]
    g = a * jax.nn.sigmoid(b)                                # GLU
    out = jnp.einsum("btc,oc->bto", g, conv2_weight[:, :, 0]) + conv2_bias
    return out


if __name__ == "__main__":
    key = jax.random.PRNGKey(0)
    kx, kw1, kw2, kb2 = jax.random.split(key, 4)

    B, T, C = 2, 16, 32          # batch=2, seq=16, in_channels=32
    k, dilation = 3, 1

    x = jax.random.normal(kx, (B, T, C), dtype=jnp.float32)
    conv1_weight = jax.random.normal(kw1, (2 * C, C, k), dtype=jnp.float32) * 0.1
    conv2_weight = jax.random.normal(kw2, (C, C, 1), dtype=jnp.float32) * 0.1
    conv2_bias = jax.random.normal(kb2, (C,), dtype=jnp.float32) * 0.1

    # block_t=8 with T=16 gives 2 time tiles per batch, exercising both the
    # zero-halo (t==0) path and the previous-tile halo slab path.
    out = mask_gate_linear_unit_conv(
        x, conv1_weight, conv2_weight, conv2_bias,
        k=k, dilation=dilation, block_t=8)
    out = jax.block_until_ready(out)

    ref = _reference(x, conv1_weight, conv2_weight, conv2_bias, k, dilation)
    assert out.shape == (B, T, C), out.shape
    # bf16 MXU inputs with f32 accumulation: loosen the tolerance accordingly.
    assert jnp.allclose(out, ref, rtol=5e-2, atol=5e-2), float(
        jnp.max(jnp.abs(out - ref)))

    print("KERNEL_OK")
</pallas_src>

<mosaic_0001>
module attributes {stable_mosaic.version = 11 : i64} {
  func.func @_mask_glu_conv_kernel(%arg0: i32, %arg1: i32, %arg2: memref<1x8x128xf32, #tpu.memory_space<vmem>>, %arg3: memref<1x1x8x128xf32, #tpu.memory_space<vmem>>, %arg4: memref<3x128x256xbf16, #tpu.memory_space<vmem>>, %arg5: memref<128x128xbf16, #tpu.memory_space<vmem>>, %arg6: memref<1x128xf32, #tpu.memory_space<vmem>>, %arg7: memref<1x8x128xf32, #tpu.memory_space<vmem>>, %arg8: memref<16x128xbf16, #tpu.memory_space<vmem>>) attributes {dimension_semantics = [#tpu.dimension_semantics<parallel>, #tpu.dimension_semantics<parallel>], iteration_bounds = array<i64: 2, 2>, scalar_prefetch = 0 : i64, scratch_operands = 1 : i64, tpu.core_type = #tpu.core_type<tc>, window_params = [{transform_indices = @transform_0, window_bounds = array<i64: 1, 8, 128>}, {transform_indices = @transform_1, window_bounds = array<i64: 1, 1, 8, 128>}, {pipeline_mode = #tpu.pipeline_mode<synchronous>, transform_indices = @transform_2, window_bounds = array<i64: 3, 128, 256>}, {pipeline_mode = #tpu.pipeline_mode<synchronous>, transform_indices = @transform_3, window_bounds = array<i64: 128, 128>}, {pipeline_mode = #tpu.pipeline_mode<synchronous>, transform_indices = @transform_4, window_bounds = array<i64: 1, 128>}, {transform_indices = @transform_5, window_bounds = array<i64: 1, 8, 128>}]} {
    %c0 = arith.constant 0 : index
    %c0_0 = arith.constant 0 : index
    %c0_1 = arith.constant 0 : index
    %c0_2 = arith.constant 0 : index
    %0 = vector.load %arg3[%c0, %c0_0, %c0_1, %c0_2] : memref<1x1x8x128xf32, #tpu.memory_space<vmem>>, vector<1x1x8x128xf32>
    %1 = vector.shape_cast %0 : vector<1x1x8x128xf32> to vector<8x128xf32>
    %2 = arith.truncf %1 : vector<8x128xf32> to vector<8x128xbf16>
    %c0_3 = arith.constant 0 : index
    %c0_4 = arith.constant 0 : index
    %3 = vector.load %arg8[%c0_3, %c0_4] : memref<16x128xbf16, #tpu.memory_space<vmem>>, vector<8x128xbf16>
    tpu.vector_store %arg8[%c0_3, %c0_4], %2 {strides = array<i32>} : memref<16x128xbf16, #tpu.memory_space<vmem>>, vector<8x128xbf16>,
    %c0_5 = arith.constant 0 : index
    %c0_6 = arith.constant 0 : index
    %c0_7 = arith.constant 0 : index
    %4 = vector.load %arg2[%c0_5, %c0_6, %c0_7] : memref<1x8x128xf32, #tpu.memory_space<vmem>>, vector<1x8x128xf32>
    %5 = vector.shape_cast %4 : vector<1x8x128xf32> to vector<8x128xf32>
    %6 = arith.truncf %5 : vector<8x128xf32> to vector<8x128xbf16>
    %c8 = arith.constant 8 : index
    %c0_8 = arith.constant 0 : index
    %7 = vector.load %arg8[%c8, %c0_8] : memref<16x128xbf16, #tpu.memory_space<vmem>>, vector<8x128xbf16>
    tpu.vector_store %arg8[%c8, %c0_8], %6 {strides = array<i32>} : memref<16x128xbf16, #tpu.memory_space<vmem>>, vector<8x128xbf16>,
    %c6 = arith.constant 6 : index
    %c0_9 = arith.constant 0 : index
    %8 = vector.load %arg8[%c6, %c0_9] : memref<16x128xbf16, #tpu.memory_space<vmem>>, vector<8x128xbf16>
    %c0_10 = arith.constant 0 : index
    %c0_11 = arith.constant 0 : index
    %c0_12 = arith.constant 0 : index
    %9 = vector.load %arg4[%c0_10, %c0_11, %c0_12] : memref<3x128x256xbf16, #tpu.memory_space<vmem>>, vector<1x128x256xbf16>
    %10 = vector.shape_cast %9 : vector<1x128x256xbf16> to vector<128x256xbf16>
    %cst = arith.constant dense<0.000000e+00> : vector<8x256xf32>
    %11 = tpu.matmul %8, %10, %cst {dimension_numbers = #tpu.dot_dimension_numbers<[1], [0], [0], [1], [0, 0, 1, 1], [], []>} : vector<8x128xbf16>, vector<128x256xbf16>, vector<8x256xf32> -> vector<8x256xf32>
    %c7 = arith.constant 7 : index
    %c0_13 = arith.constant 0 : index
    %12 = vector.load %arg8[%c7, %c0_13] : memref<16x128xbf16, #tpu.memory_space<vmem>>, vector<8x128xbf16>
    %c1 = arith.constant 1 : index
    %c0_14 = arith.constant 0 : index
    %c0_15 = arith.constant 0 : index
    %13 = vector.load %arg4[%c1, %c0_14, %c0_15] : memref<3x128x256xbf16, #tpu.memory_space<vmem>>, vector<1x128x256xbf16>
    %14 = vector.shape_cast %13 : vector<1x128x256xbf16> to vector<128x256xbf16>
    %cst_16 = arith.constant dense<0.000000e+00> : vector<8x256xf32>
    %15 = tpu.matmul %12, %14, %cst_16 {dimension_numbers = #tpu.dot_dimension_numbers<[1], [0], [0], [1], [0, 0, 1, 1], [], []>} : vector<8x128xbf16>, vector<128x256xbf16>, vector<8x256xf32> -> vector<8x256xf32>
    %16 = arith.addf %11, %15 : vector<8x256xf32>
    %c8_17 = arith.constant 8 : index
    %c0_18 = arith.constant 0 : index
    %17 = vector.load %arg8[%c8_17, %c0_18] : memref<16x128xbf16, #tpu.memory_space<vmem>>, vector<8x128xbf16>
    %c2 = arith.constant 2 : index
    %c0_19 = arith.constant 0 : index
    %c0_20 = arith.constant 0 : index
    %18 = vector.load %arg4[%c2, %c0_19, %c0_20] : memref<3x128x256xbf16, #tpu.memory_space<vmem>>, vector<1x128x256xbf16>
    %19 = vector.shape_cast %18 : vector<1x128x256xbf16> to vector<128x256xbf16>
    %cst_21 = arith.constant dense<0.000000e+00> : vector<8x256xf32>
    %20 = tpu.matmul %17, %19, %cst_21 {dimension_numbers = #tpu.dot_dimension_numbers<[1], [0], [0], [1], [0, 0, 1, 1], [], []>} : vector<8x128xbf16>, vector<128x256xbf16>, vector<8x256xf32> -> vector<8x256xf32>
    %21 = arith.addf %16, %20 : vector<8x256xf32>
    %22 = vector.extract_strided_slice %21 {offsets = [0, 0], sizes = [8, 128], strides = [1, 1]} : vector<8x256xf32> to vector<8x128xf32>
    %23 = vector.extract_strided_slice %21 {offsets = [0, 128], sizes = [8, 128], strides = [1, 1]} : vector<8x256xf32> to vector<8x128xf32>
    %24 = arith.negf %23 : vector<8x128xf32>
    %25 = math.exp %24 : vector<8x128xf32>
    %cst_22 = arith.constant 1.000000e+00 : f32
    %26 = vector.broadcast %cst_22 : f32 to vector<8x128xf32>
    %27 = arith.addf %26, %25 : vector<8x128xf32>
    %28 = arith.divf %26, %27 : vector<8x128xf32>
    %29 = arith.mulf %22, %28 : vector<8x128xf32>
    %30 = arith.truncf %29 : vector<8x128xf32> to vector<8x128xbf16>
    %c0_23 = arith.constant 0 : index
    %c0_24 = arith.constant 0 : index
    %31 = vector.load %arg5[%c0_23, %c0_24] : memref<128x128xbf16, #tpu.memory_space<vmem>>, vector<128x128xbf16>
    %cst_25 = arith.constant dense<0.000000e+00> : vector<8x128xf32>
    %32 = tpu.matmul %30, %31, %cst_25 {dimension_numbers = #tpu.dot_dimension_numbers<[1], [0], [0], [1], [0, 0, 1, 1], [], []>} : vector<8x128xbf16>, vector<128x128xbf16>, vector<8x128xf32> -> vector<8x128xf32>
    %c0_26 = arith.constant 0 : index
    %c0_27 = arith.constant 0 : index
    %33 = vector.load %arg6[%c0_26, %c0_27] : memref<1x128xf32, #tpu.memory_space<vmem>>, vector<1x128xf32>
    %34 = vector.broadcast %33 : vector<1x128xf32> to vector<8x128xf32>
    %35 = arith.addf %32, %34 : vector<8x128xf32>
    %c0_28 = arith.constant 0 : index
    %c0_29 = arith.constant 0 : index
    %c0_30 = arith.constant 0 : index
    %36 = vector.load %arg7[%c0_28, %c0_29, %c0_30] : memref<1x8x128xf32, #tpu.memory_space<vmem>>, vector<1x8x128xf32>
    %37 = vector.shape_cast %36 : vector<1x8x128xf32> to vector<8x128xf32>
    %38 = vector.shape_cast %35 : vector<8x128xf32> to vector<1x8x128xf32>
    tpu.vector_store %arg7[%c0_28, %c0_29, %c0_30], %38 {strides = array<i32>} : memref<1x8x128xf32, #tpu.memory_space<vmem>>, vector<1x8x128xf32>,
    return
  }
  func.func @transform_0(%arg0: i32, %arg1: i32) -> (i32, i32, i32) {
    %c0_i32 = arith.constant 0 : i32
    %c0_i32_0 = arith.constant 0 : i32
    return %arg0, %arg1, %c0_i32 : i32, i32, i32
  }
  func.func @transform_1(%arg0: i32, %arg1: i32) -> (i32, i32, i32, i32) {
    %c0_i32 = arith.constant 0 : i32
    %c0_i32_0 = arith.constant 0 : i32
    %c0_i32_1 = arith.constant 0 : i32
    return %arg0, %arg1, %c0_i32, %c0_i32_0 : i32, i32, i32, i32
  }
  func.func @transform_2(%arg0: i32, %arg1: i32) -> (i32, i32, i32) {
    %c0_i32 = arith.constant 0 : i32
    %c0_i32_0 = arith.constant 0 : i32
    %c0_i32_1 = arith.constant 0 : i32
    %c0_i32_2 = arith.constant 0 : i32
    return %c0_i32, %c0_i32_0, %c0_i32_1 : i32, i32, i32
  }
  func.func @transform_3(%arg0: i32, %arg1: i32) -> (i32, i32) {
    %c0_i32 = arith.constant 0 : i32
    %c0_i32_0 = arith.constant 0 : i32
    %c0_i32_1 = arith.constant 0 : i32
    return %c0_i32, %c0_i32_0 : i32, i32
  }
  func.func @transform_4(%arg0: i32, %arg1: i32) -> (i32, i32) {
    %c0_i32 = arith.constant 0 : i32
    %c0_i32_0 = arith.constant 0 : i32
    %c0_i32_1 = arith.constant 0 : i32
    return %c0_i32, %c0_i32_0 : i32, i32
  }
  func.func @transform_5(%arg0: i32, %arg1: i32) -> (i32, i32, i32) {
    %c0_i32 = arith.constant 0 : i32
    %c0_i32_0 = arith.constant 0 : i32
    return %arg0, %arg1, %c0_i32 : i32, i32, i32
  }
}

</mosaic_0001>

<bundles_post_ra>
// kernel: tpu_custom_call.1
= control target key start
LH: loop header
LB: loop body
LE: loop exit
PB: predicated region body
PF: predicated region fallthrough
CT: control target
= control target key end

     0   :  { %s1939_s0 = inlined_call_operand.hbm [shape: f32[2,16,128], index: 0, kind: input, shape index: {}]   ;;  %s1940_s1 = inlined_call_operand.hbm [shape: f32[2,2,8,128], index: 1, kind: input, shape index: {}]   ;;  %s1941_s2 = inlined_call_operand.hbm [shape: bf16[3,128,256], index: 2, kind: input, shape index: {}]   ;;  %s1942_s3 = inlined_call_operand.hbm [shape: bf16[128,128], index: 3, kind: input, shape index: {}]   ;;  %s1943_s4 = inlined_call_operand.vmem [shape: f32[1,128], index: 4, kind: input, shape index: {}]   ;;  %s1944_s5 = inlined_call_operand.hbm [shape: f32[2,16,128], index: 5, kind: output, shape index: {}]  }
   0x1   :  { %1954 = sst [smem:[#allocation21_spill]] %s1941_s2 }
   0x2   :  { %1955 = sst [smem:[#allocation22_spill]] %s1942_s3 }
   0x3   :  { %1956 = sst [smem:[#allocation23_spill]] %s1944_s5 }
   0x4   :  { %10 = vsyncpa [#allocation4], 0 }
   0x5   :  { %12 = vsyncpa [#allocation4 + $0x1], 0 }
   0x6   :  { %13 = vsyncpa [#allocation7], 0 }
   0x7   :  { %15 = vsyncpa [#allocation7 + $0x1], 0 }
   0x8   :  { %16 = vsyncpa [#allocation10], 0 }
   0x9   :  { %17 = vsyncpa [#allocation5], 0 }
   0xa   :  { %19 = vsyncpa [#allocation5 + $0x1], 0  ;;  %s1617_s18 = smov 0   ;;  %s1619_s19 = smov 0  }
   0xb   :  { %s1621_s20 = smov 0   ;;  %s1623_s21 = smov 0  }
   0xc   :  { %s1625_s22 = smov 0   ;;  %s1627_s23 = smov 0  }
   0xd   :  { %s1629_s24 = smov 0   ;;  %s1631_s25 = smov 0  }
   0xe LB: > { %1957 = sst [smem:[#allocation17_spill]] %s1545_s18  ;;  %s1658_s26 = sadd.s32 4294967295, %s1573_s25   ;;  %s1573_s25 = sphi %s1631_s25, %s25_s25   ;;  %s1569_s24 = sphi %s1629_s24, %s1990_s24   ;;  %s1565_s23 = sphi %s1627_s23, %s1989_s23   ;;  %s1561_s22 = sphi %s1625_s22, %s1988_s22   ;;  %s1557_s21 = sphi %s1623_s21, %s1987_s21   ;;  %s1553_s20 = sphi %s1621_s20, %s1986_s20   ;;  %s1549_s19 = sphi %s1619_s19, %s1985_s19   ;;  %s1545_s18 = sphi %s1617_s18, %s1984_s18  }
   0xf   : > { %s1037_s27 = sadd.s32 4294967294, %s1573_s25   ;;  %p59_p0 = scmp.ne.s32.totalorder %s1549_s19, %s1545_s18 }
  0x10   : > { %p1945_p1 = scmp.eq.s32.totalorder %s1658_s26, 0  ;;  %p182_p3 = scmp.eq.s32.totalorder %s1037_s27, 3 }
  0x11   : > { %p1038_p5 = scmp.ge.s32.totalorder %s1573_s25, 1  ;;  %p189_p7 = scmp.lt.s32.totalorder %s1573_s25, 5 }
  0x12   : > { %p1667_p4 = por %p1945_p1, %p59_p0  ;;  %p1672_p6 = por %p182_p3, %p59_p0 }
  0x13   : > { %p1677_p8 = pnand %p1038_p5, %p189_p7  ;;  %s1575_s6 = smov [#allocation8]  }
  0x14   : > { %s1958_s28 = scalar_select %p1667_p4, 1, 0 }
  0x15   : > { %s1959_s29 = scalar_select %p1672_p6, 1, 0 }
  0x16   : > { %s1961_s30 = scalar_select %p1677_p8, 1, 0 }
  0x17   : > { %1960 = sst [smem:[#allocation18_spill]] %s1959_s29  ;;  %s201_s7 = sshll.u32 %s1575_s6, 4  ;;  %s202_s7 = int_to_ptr.vmem [resolvable:$true] %s201_s7 }
  0x18   : > { %p1166_p9 = pneg %p1677_p8  ;;  %s1576_s9 = smov [#allocation9]  }
  0x19   : > { %s214_s10 = sshll.u32 %s1576_s9, 4  ;;  %s1963_s2 = sld [smem:[#allocation21_spill]]  ;;  %s1689_s10 = int_to_ptr.vmem [resolvable:$true] %s214_s10 }
  0x1a   : > { %p1685_p10 = pnand %p1166_p9, %p1945_p1 }
  0x1c   : > { %p1349_p12 = pneg %p1685_p10 }
  0x1f   : > { %s1347_s13 = scalar_lea.hbm %s1963_s2, 6144 }
  0x20   : > { %p1348_p11 = scmp.ne.s32.totalorder %s1963_s2, %s1347_s13  ;;  %p1354_p3 = scmp.lt.u32.totalorder %s1347_s13, %s1963_s2 }
  0x22   : > { %p1350_p13 = pnand %p1349_p12, %p1348_p11 }
  0x24   : > { %p1351_p0 = pneg %p1350_p13 }
  0x26   : > { %p1356_p5 = pnand %p1354_p3, %p1351_p0 }
  0x28   : > { %1359 = shalt.err (!%p1356_p5)
}
  0x29   : > { %s1360_s27 = scalar_lea.vmem %s202_s7, 6144  ;;  %p1368_p2 = scmp.lt.s32.totalorder %s202_s7, %s202_s7 }
  0x2a   : > { %p1361_p7 = scmp.ne.s32.totalorder %s202_s7, %s1360_s27  ;;  %p1369_p6 = scmp.lt.s32.totalorder %s1360_s27, %s1360_s27 }
  0x2c   : > { %p1363_p9 = pnand %p1361_p7, %p1349_p12  ;;  %p1370_p4 = por %p1369_p6, %p1368_p2 }
  0x2e   : > { %p1364_p1 = pneg %p1363_p9 }
  0x30   : > { %p1371_p8 = pnand %p1370_p4, %p1364_p1 }
  0x32   : > { %1374 = shalt.err (!%p1371_p8)
}
  0x33   : > { %s1577_s6 = smov 128   ;;  %s1578_s9 = smov 8  }
  0x34   : > { %1169 = dma.hbm_to_vmem [thread:$0]  (!%p1685_p10), %s1963_s2, 6144, %s202_s7, [#allocation7], %s1577_s6, %s1577_s6, %s1578_s9  }
  0x35   : > { %s1964_s3 = sld [smem:[#allocation22_spill]] }
  0x3b   : > { %s1375_s15 = scalar_lea.hbm %s1964_s3, 1024 }
  0x3c   : > { %p1376_p11 = scmp.ne.s32.totalorder %s1964_s3, %s1375_s15  ;;  %p1382_p4 = scmp.lt.u32.totalorder %s1375_s15, %s1964_s3 }
  0x3e   : > { %p1378_p1 = pnand %p1376_p11, %p1349_p12 }
  0x40   : > { %p1379_p2 = pneg %p1378_p1 }
  0x42   : > { %p1384_p6 = pnand %p1382_p4, %p1379_p2 }
  0x44   : > { %1387 = shalt.err (!%p1384_p6)
}
  0x45   : > { %s1388_s7 = scalar_lea.vmem %s1689_s10, 1024  ;;  %p1396_p3 = scmp.lt.s32.totalorder %s1689_s10, %s1689_s10 }
  0x46   : > { %p1389_p8 = scmp.ne.s32.totalorder %s1689_s10, %s1388_s7  ;;  %p1397_p5 = scmp.lt.s32.totalorder %s1388_s7, %s1388_s7 }
  0x48   : > { %p1391_p13 = pnand %p1389_p8, %p1349_p12  ;;  %p1398_p7 = por %p1397_p5, %p1396_p3 }
  0x4a   : > { %p1392_p0 = pneg %p1391_p13 }
  0x4c   : > { %p1399_p9 = pnand %p1398_p7, %p1392_p0 }
  0x4e   : > { %1402 = shalt.err (!%p1399_p9)
}
  0x4f   : > { %s1579_s29 = smov 64   ;;  %s1580_s6 = smov 4  }
  0x50   : > { %1172 = dma.hbm_to_vmem [thread:$0]  (!%p1685_p10), %s1964_s3, 1024, %s1689_s10, [#allocation10], %s1579_s29, %s1579_s29, %s1580_s6  }
  0x51   : > { %s34_s12 = sadd.s32 1, %s1565_s23  ;;  %s37_s13 = sadd.s32 1, %s1569_s24 }
  0x52   : > { %p35_p12 = scmp.ge.s32.totalorder %s34_s12, 2  ;;  %s46_s14 = sadd.s32 1, %s1553_s20 }
  0x53   : > { %p53_p11 = scmp.ne.s32.totalorder %s1553_s20, %s1549_s19  ;;  %p54_p1 = scmp.eq.s32.totalorder %s1573_s25, 0 }
  0x54   : > { %s1992_s12 = smov (%p35_p12, %s34_s12), 0  ;;  %s1994_s13 = smov (!%p35_p12, %s37_s13), %s1569_s24 }
  0x55   : > { %1965 = sst [smem:[#allocation19_spill]] %s1992_s12  ;;  %s42_s15 = ssub.s32 %s1565_s23, %s1992_s12 }
  0x56   : > { %p1749_p2 = por %p54_p1, %p53_p11  ;;  %p39_p10 = scmp.ge.s32.totalorder %s1994_s13, 2 }
  0x57   : > { %p1967_p4 = scmp.eq.s32.totalorder %s1658_s26, 3  ;;  %p1186_p8 = scmp.lt.s32.totalorder %s1573_s25, 4 }
  0x58   : > { %s231_s16 = sand.u32 1, %s1553_s20   ;;  %s1996_s13 = smov (%p39_p10, %s1994_s13), 0 }
  0x59   : > { %p1755_p6 = por %p1967_p4, %p53_p11  ;;  %1969 = sst [smem:[#allocation20_spill]] %s1996_s13 }
  0x5a   : > { %s1763_s17 = sshll.u32 %s231_s16, 3  ;;  %s41_s27 = ssub.s32 %s1569_s24, %s1996_s13 }
  0x5b   : > { %s1968_s10 = scalar_select %p1755_p6, 1, 0 }
  0x5c   : > { %s43_s7 = sor.u32 %s42_s15, %s41_s27  ;;  %s1043_s29 = sshll.u32 %s1569_s24, 1 }
  0x5d   : > { %p44_p13 = scmp.eq.s32.totalorder %s43_s7, 0  ;;  %s240_s6 = sadd.s32 %s1565_s23, %s1043_s29 }
  0x5e   : > { %s1044_s9 = sshll.u32 %s240_s6, 7  ;;  %s235_s11 = scalar_lea.vmem [#allocation3], %s1763_s17 }
  0x5f   : > { %s244_s2 = sshll.u32 %s235_s11, 4  ;;  %s1776_s5 = scalar_lea.hbm %s1939_s0, %s1044_s9  ;;  %s1778_s2 = int_to_ptr.vmem [resolvable:$true] %s244_s2 }
  0x60   : > { %s1771_s3 = scalar_select %p44_p13, %s1553_s20, %s46_s14  }
  0x61   : > { %p1784_p0 = pnand %p1186_p8, %p1749_p2  ;;  %s1791_s18 = scalar_lea.hbm %s1940_s1, %s1044_s9 }
  0x62   : > { %s251_s12 = sand.u32 1, %s1573_s25   ;;  %s232_s7 = scalar_lea.sflag [#allocation4], %s231_s16 }
  0x63   : > { %s1403_s29 = scalar_lea.hbm %s1776_s5, 128  ;;  %p1405_p5 = pneg %p1784_p0 }
  0x64   : > { %p1404_p3 = scmp.ne.s32.totalorder %s1776_s5, %s1403_s29  ;;  %s1408_s11 = scalar_lea.hbm %s1939_s0, 512 }
  0x65   : > { %p1409_p12 = scmp.lt.u32.totalorder %s1776_s5, %s1939_s0  ;;  %p1410_p11 = scmp.lt.u32.totalorder %s1408_s11, %s1403_s29 }
  0x66   : > { %p1406_p7 = pnand %p1405_p5, %p1404_p3  ;;  %p1412_p2 = scmp.lt.u32.totalorder %s1403_s29, %s1776_s5 }
  0x67   : > { %p1411_p1 = por %p1410_p11, %p1409_p12 }
  0x68   : > { %p1407_p9 = pneg %p1406_p7 }
  0x69   : > { %p1413_p10 = por %p1412_p2, %p1411_p1 }
  0x6b   : > { %p1414_p4 = pnand %p1413_p10, %p1407_p9 }
  0x6d   : > { %1417 = shalt.err (!%p1414_p4)
}
  0x6e   : > { %s1418_s16 = scalar_lea.vmem %s1778_s2, 128  ;;  %s1581_s9 = smov [#allocation3]  }
  0x6f   : > { %p1419_p8 = scmp.ne.s32.totalorder %s1778_s2, %s1418_s16  ;;  %s1423_s14 = sshll.u32 %s1581_s9, 4  ;;  %s1424_s14 = int_to_ptr.vmem [resolvable:$false] %s1423_s14 }
  0x70   : > { %s1425_s13 = scalar_lea.vmem %s1424_s14, 256  ;;  %p1426_p7 = scmp.lt.s32.totalorder %s1778_s2, %s1424_s14 }
  0x71   : > { %p1421_p13 = pnand %p1419_p8, %p1405_p5  ;;  %p1427_p12 = scmp.lt.s32.totalorder %s1425_s13, %s1418_s16 }
  0x73   : > { %p1422_p3 = pneg %p1421_p13  ;;  %p1428_p11 = por %p1427_p12, %p1426_p7 }
  0x75   : > { %p1429_p1 = pnand %p1428_p11, %p1422_p3 }
  0x77   : > { %1432 = shalt.err (!%p1429_p1)
}
  0x78   : > { %1176 = dma.hbm_to_vmem [thread:$0]  (!%p1784_p0), %s1776_s5, 128, %s1778_s2, %s232_s7  }
  0x79   : > { %s255_s29 = scalar_lea.vmem [#allocation6], %s1763_s17  ;;  %s252_s6 = scalar_lea.sflag [#allocation7], %s251_s12 }
  0x7a   : > { %s264_s8 = sshll.u32 %s255_s29, 4  ;;  %s1433_s11 = scalar_lea.hbm %s1791_s18, 128  ;;  %s265_s8 = int_to_ptr.vmem [resolvable:$true] %s264_s8 }
  0x7b   : > { %p1434_p9 = scmp.ne.s32.totalorder %s1791_s18, %s1433_s11  ;;  %s1438_s9 = scalar_lea.hbm %s1940_s1, 512 }
  0x7c   : > { %p1439_p4 = scmp.lt.u32.totalorder %s1791_s18, %s1940_s1  ;;  %p1440_p8 = scmp.lt.u32.totalorder %s1438_s9, %s1433_s11 }
  0x7d   : > { %p1436_p2 = pnand %p1434_p9, %p1405_p5  ;;  %p1442_p3 = scmp.lt.u32.totalorder %s1433_s11, %s1791_s18 }
  0x7e   : > { %p1441_p13 = por %p1440_p8, %p1439_p4 }
  0x7f   : > { %p1437_p10 = pneg %p1436_p2 }
  0x80   : > { %p1443_p7 = por %p1442_p3, %p1441_p13 }
  0x82   : > { %p1444_p12 = pnand %p1443_p7, %p1437_p10 }
  0x84   : > { %1447 = shalt.err (!%p1444_p12)
}
  0x85   : > { %s1448_s2 = scalar_lea.vmem %s265_s8, 128  ;;  %s1582_s5 = smov [#allocation6]  }
  0x86   : > { %p1449_p11 = scmp.ne.s32.totalorder %s265_s8, %s1448_s2  ;;  %s1453_s17 = sshll.u32 %s1582_s5, 4  ;;  %s1454_s17 = int_to_ptr.vmem [resolvable:$false] %s1453_s17 }
  0x87   : > { %s1455_s12 = scalar_lea.vmem %s1454_s17, 256  ;;  %p1456_p2 = scmp.lt.s32.totalorder %s265_s8, %s1454_s17 }
  0x88   : > { %p1451_p1 = pnand %p1449_p11, %p1405_p5  ;;  %p1457_p6 = scmp.lt.s32.totalorder %s1455_s12, %s1448_s2 }
  0x8a   : > { %p1452_p9 = pneg %p1451_p1  ;;  %p1458_p4 = por %p1457_p6, %p1456_p2 }
  0x8c   : > { %p1459_p8 = pnand %p1458_p4, %p1452_p9 }
  0x8e   : > { %1462 = shalt.err (!%p1459_p8)
}
  0x8f   : > { %1179 = dma.hbm_to_vmem [thread:$0]  (!%p1784_p0), %s1791_s18, 128, %s265_s8, %s252_s6  }
  0x90   : > { %p1971_p10 = scmp.ne.s32.totalorder %s1961_s30, 0 }
  0x91   : > { %s1844_s7 = sand.u32 (!%p1971_p10), 1, %s1549_s19   ;;  %p1972_p6 = scmp.ne.s32.totalorder (!%p1971_p10), %s1958_s28, 0 }
  0x92   : > { %273 = sbr.rel (%p1971_p10) target bundleno = 702 (0x2be), region = 40  ;;  %s1847_s29 = sshll.u32 (!%p1971_p10), %s1844_s7, 3 }
  0x93   : > { %s276_s11 = scalar_lea.sflag (!%p1971_p10), [#allocation4], %s1844_s7  ;;  %s279_s27 = scalar_lea.vmem (!%p1971_p10), [#allocation3], %s1847_s29 }
  0x99   : > { %1524 = dma.done.wait (%p1972_p6), %s276_s11, 128  }
  0x9a   : > { %1526 = vsyncadd (%p1972_p6), %s276_s11, 4294967168  ;;  %s284_s30 = sand.u32 1, %s1658_s26   ;;  %s288_s18 = scalar_lea.vmem [#allocation6], %s1847_s29 }
  0x9b   : > { %s285_s15 = scalar_lea.sflag [#allocation7], %s284_s30 }
  0x9c   : > { %1528 = dma.done.wait (%p1972_p6), %s285_s15, 128  }
  0x9d   : > { %1530 = vsyncadd (%p1972_p6), %s285_s15, 4294967168  ;;  %p1973_p0 = scmp.eq.s32.totalorder %s1658_s26, 0 }
  0x9f   : > { %1532 = dma.done.wait (%p1973_p0), [#allocation7], 6144   ;;  %p1974_p5 = pmov %p1973_p0 }
  0xa0   : > { %p1975_p13 = pmov %p1973_p0 }
  0xa1   : > { %1534 = vsyncadd (%p1974_p5), [#allocation7], 4294961152 }
  0xa2   : > { %1536 = dma.done.wait (%p1975_p13), [#allocation10], 1024   ;;  %p1976_p3 = pmov %p1973_p0 }
  0xa3   : > { %v1583_v0 = vmov 0   ;;  %v1263_v1 = vld [vmem:[#allocation8 + $0x4] ss:$8 sps:$4 sm:$0xff]   ;;  %v1265_v2 = vld [vmem:[#allocation8] ss:$8 sps:$4 sm:$0xff]   ;;  %v329_v14 = vld [vmem:[%s288_s18] sm:$0xff] }
  0xa4   : > { %1538 = vsyncadd (%p1976_p3), [#allocation10], 4294966272  ;;  %618 = vmatprep.mubr.bf16.mxu0 %v1583_v0  ;;  %494 = vmatprep.mubr.bf16.mxu1 %v1583_v0  ;;  %v1266_v3 = vld [vmem:[#allocation8 + $0x14] ss:$8 sps:$4 sm:$0xff]   ;;  %v1268_v4 = vld [vmem:[#allocation8 + $0x10] ss:$8 sps:$4 sm:$0xff]   ;;  %v330_v16 = vpack.c.bf16 %v329_v14, %v329_v14 }
  0xa5   : > { %586 = vmatprep.subr.bf16.mxu0 %v1263_v1  ;;  %v1269_v5 = vld [vmem:[#allocation8 + $0x24] ss:$8 sps:$4 sm:$0xff]   ;;  %v1271_v6 = vld [vmem:[#allocation8 + $0x20] ss:$8 sps:$4 sm:$0xff]   ;;  %v1272_v7 = vld [vmem:[#allocation8 + $0x34] ss:$8 sps:$4 sm:$0xff]  }
  0xa6   : > { %587 = vmatpush1.bf16.msra.mxu0 %v1265_v2  ;;  %v1274_v8 = vld [vmem:[#allocation8 + $0x30] ss:$8 sps:$4 sm:$0xff]   ;;  %v1286_v9 = vld [vmem:[#allocation8 + $0x84] ss:$8 sps:$4 sm:$0xff]   ;;  %v1289_v10 = vld [vmem:[#allocation8 + $0x80] ss:$8 sps:$4 sm:$0xff]  }
  0xa7   : > { %588 = vmatprep.subr.bf16.mxu0 %v1266_v3  ;;  %v1275_v11 = vld [vmem:[#allocation8 + $0x44] ss:$8 sps:$4 sm:$0xff]   ;;  %v1277_v12 = vld [vmem:[#allocation8 + $0x40] ss:$8 sps:$4 sm:$0xff]   ;;  %462 = vmatprep.subr.bf16.mxu1 %v1286_v9  ;;  %v1293_v13 = vld [vmem:[#allocation8 + $0x94] ss:$8 sps:$4 sm:$0xff]  }
  0xa8   : > { %463 = vmatpush1.bf16.msra.mxu1 %v1289_v10  ;;  %v332_v15 = vld [vmem:[%s279_s27] sm:$0xff]  ;;  %v1295_v18 = vld [vmem:[#allocation8 + $0x90] ss:$8 sps:$4 sm:$0xff]   ;;  %v1278_v19 = vld [vmem:[#allocation8 + $0x54] ss:$8 sps:$4 sm:$0xff]   ;;  %v1584_v1 = vmov 0.0  }
  0xa9   : > { %v333_v17 = vpack.c.bf16 %v332_v15, %v332_v15  ;;  %464 = vmatprep.subr.bf16.mxu1 %v1293_v13  ;;  %331 = vst [vmem:[#allocation2] sm:$0xf] %v330_v16  ;;  %v1299_v21 = vld [vmem:[#allocation8 + $0xa4] ss:$8 sps:$4 sm:$0xff]   ;;  %v1301_v22 = vld [vmem:[#allocation8 + $0xa0] ss:$8 sps:$4 sm:$0xff]  }
  0xaa   : > { %589 = vmatpush1.bf16.msra.mxu0 %v1268_v4  ;;  %v1280_v23 = vld [vmem:[#allocation8 + $0x50] ss:$8 sps:$4 sm:$0xff]   ;;  %v1281_v24 = vld [vmem:[#allocation8 + $0x64] ss:$8 sps:$4 sm:$0xff]   ;;  %v1305_v25 = vld [vmem:[#allocation8 + $0xb4] ss:$8 sps:$4 sm:$0xff]  }
  0xab   : > { %590 = vmatprep.subr.bf16.mxu0 %v1269_v5  ;;  %v335_v20 = vrot.slane %v333_v17, 4  ;;  %v1283_v26 = vld [vmem:[#allocation8 + $0x60] ss:$8 sps:$4 sm:$0xff]   ;;  %v1307_v27 = vld [vmem:[#allocation8 + $0xb0] ss:$8 sps:$4 sm:$0xff]   ;;  %vm1585_vm0 = vmmov 0  }
  0xac   : > { %465 = vmatpush1.bf16.msra.mxu1 %v1295_v18  ;;  %v1311_v28 = vld [vmem:[#allocation8 + $0xc4] ss:$8 sps:$4 sm:$0xff]   ;;  %v1284_v29 = vld [vmem:[#allocation8 + $0x74] ss:$8 sps:$4 sm:$0xff]   ;;  %v1288_v30 = vld [vmem:[#allocation8 + $0x70] ss:$8 sps:$4 sm:$0xff]  }
  0xad   : > { %337 = vst [vmem:[#allocation2] sm:$0xf0] %v335_v20  ;;  %466 = vmatprep.subr.bf16.mxu1 %v1299_v21  ;;  %v1313_v31 = vld [vmem:[#allocation8 + $0xc0] ss:$8 sps:$4 sm:$0xff]   ;;  %v1317_v33 = vld [vmem:[#allocation8 + $0xd4] ss:$8 sps:$4 sm:$0xff]  }
  0xae   : > { %591 = vmatpush1.bf16.msra.mxu0 %v1271_v6  ;;  %v1292_v34 = vld [vmem:[#allocation8 + $0x104] ss:$8 sps:$4 sm:$0xff]   ;;  %v1319_v36 = vld [vmem:[#allocation8 + $0xd0] ss:$8 sps:$4 sm:$0xff]   ;;  %v1290_v37 = vld [vmem:[#allocation8 + $0x100] ss:$8 sps:$4 sm:$0xff]  }
  0xaf   : > { %592 = vmatprep.subr.bf16.mxu0 %v1272_v7  ;;  %v1323_v38 = vld [vmem:[#allocation8 + $0xe4] ss:$8 sps:$4 sm:$0xff]   ;;  %v1298_v39 = vld [vmem:[#allocation8 + $0x114] ss:$8 sps:$4 sm:$0xff]   ;;  %v1296_v40 = vld [vmem:[#allocation8 + $0x110] ss:$8 sps:$4 sm:$0xff]  }
  0xb0   : > { %467 = vmatpush1.bf16.msra.mxu1 %v1301_v22  ;;  %v1325_v41 = vld [vmem:[#allocation8 + $0xe0] ss:$8 sps:$4 sm:$0xff]   ;;  %v1304_v43 = vld [vmem:[#allocation8 + $0x124] ss:$8 sps:$4 sm:$0xff]   ;;  %v1329_v44 = vld [vmem:[#allocation8 + $0xf4] ss:$8 sps:$4 sm:$0xff]  }
  0xb1   : > { %468 = vmatprep.subr.bf16.mxu1 %v1305_v25  ;;  %v1331_v47 = vld [vmem:[#allocation8 + $0xf0] ss:$8 sps:$4 sm:$0xff]   ;;  %v1302_v50 = vld [vmem:[#allocation8 + $0x120] ss:$8 sps:$4 sm:$0xff]   ;;  %v1310_v51 = vld [vmem:[#allocation8 + $0x134] ss:$8 sps:$4 sm:$0xff]  }
  0xb2   : > { %593 = vmatpush1.bf16.msra.mxu0 %v1274_v8  ;;  %v1308_v53 = vld [vmem:[#allocation8 + $0x130] ss:$8 sps:$4 sm:$0xff]   ;;  %v1316_v54 = vld [vmem:[#allocation8 + $0x144] ss:$8 sps:$4 sm:$0xff]   ;;  %v1314_v55 = vld [vmem:[#allocation8 + $0x140] ss:$8 sps:$4 sm:$0xff]  }
  0xb3   : > { %594 = vmatprep.subr.bf16.mxu0 %v1275_v11  ;;  %v1322_v56 = vld [vmem:[#allocation8 + $0x154] ss:$8 sps:$4 sm:$0xff]   ;;  %v1320_v57 = vld [vmem:[#allocation8 + $0x150] ss:$8 sps:$4 sm:$0xff]   ;;  %v1328_v58 = vld [vmem:[#allocation8 + $0x164] ss:$8 sps:$4 sm:$0xff]  }
  0xb4   : > { %469 = vmatpush1.bf16.msra.mxu1 %v1307_v27  ;;  %v338_v32 = vld [vmem:[#allocation2] sm:$0x78]  ;;  %v1326_v59 = vld [vmem:[#allocation8 + $0x160] ss:$8 sps:$4 sm:$0xff]   ;;  %v1337_v3 = vld [vmem:[#allocation9 + $0x10] sm:$0xff]   ;;  %s1113_s26 = sshll.u32 %s1561_s22, 1 }
  0xb5   : > { %470 = vmatprep.subr.bf16.mxu1 %v1311_v28  ;;  %v504_v35 = vrot.slane %v338_v32, 3  ;;  %v355_v42 = vld [vmem:[#allocation2] sm:$0xf8]  ;;  %v1336_v2 = vld [vmem:[#allocation9 + $0x8] sm:$0xff]   ;;  %v1339_v5 = vld [vmem:[#allocation9 + $0x20] sm:$0xff]   ;;  %s903_s28 = sadd.s32 %s1557_s21, %s1113_s26  ;;  %s327_s9 = scalar_lea.vmem [#allocation11], %s1847_s29 }
  0xb6   : > { %595 = vmatpush1.bf16.msra.mxu0 %v1277_v12  ;;  %v374_v45 = vshrl.u32 %v355_v42, 16  ;;  %v377_v46 = vshll.u32 %v355_v42, 16  ;;  %v1334_v60 = vld [vmem:[#allocation8 + $0x174] ss:$8 sps:$4 sm:$0xff]   ;;  %v1332_v61 = vld [vmem:[#allocation8 + $0x170] ss:$8 sps:$4 sm:$0xff]  }
  0xb7   : > { %596 = vmatprep.subr.bf16.mxu0 %v1278_v19  ;;  %v627_v62 = vld [vmem:[#allocation2] sm:$0xf0]  ;;  %v1340_v6 = vld [vmem:[#allocation9 + $0x28] sm:$0xff]   ;;  %v1341_v7 = vld [vmem:[#allocation9 + $0x30] sm:$0xff]   ;;  %s1114_s16 = sshll.u32 %s903_s28, 7  ;;  %s907_s14 = sshll.u32 %s327_s9, 4  ;;  %s1887_s14 = int_to_ptr.vmem [resolvable:$true] %s907_s14 }
  0xb8   : > { %471 = vmatpush1.bf16.msra.mxu1 %v1313_v31  ;;  %v376_v48 = vrot.slane %v374_v45, 3  ;;  %v379_v49 = vrot.slane %v377_v46, 4  ;;  %v646_v63 = vrot.slane %v627_v62, 4  ;;  %v1338_v4 = vld [vmem:[#allocation9 + $0x18] sm:$0xff]   ;;  %s1977_s5 = sld [smem:[#allocation23_spill]]  ;;  %s892_s21 = scalar_lea.sflag [#allocation5], %s1844_s7 }
  0xb9   : > { %472 = vmatprep.subr.bf16.mxu1 %v1317_v33  ;;  %v1342_v8 = vld [vmem:[#allocation9 + $0x38] sm:$0xff]   ;;  %s1463_s22 = scalar_lea.vmem %s1887_s14, 128  ;;  %p1978_p12 = scmp.ne.s32.totalorder %s1968_s10, 0 }
  0xba   : > { %597 = vmatpush1.bf16.msra.mxu0 %v1280_v23  ;;  %v380_v52 = vor.u32 %v379_v49, %v376_v48  ;;  %v1103_v25 = vld [vmem:[%s1943_s4] ss:$0 sm:$0xff]  ;;  %p1464_p7 = scmp.ne.s32.totalorder %s1887_s14, %s1463_s22  ;;  %s1586_s12 = smov [#allocation11]  }
  0xbb   : > { %598 = vmatprep.subr.bf16.mxu0 %v1281_v24  ;;  %s1467_s29 = sshll.u32 %s1586_s12, 4  ;;  %s1468_s29 = int_to_ptr.vmem [resolvable:$false] %s1467_s29 }
  0xbc   : > { %473 = vmatpush1.bf16.msra.mxu1 %v1319_v36  ;;  %p1465_p11 = pnand %p1464_p7, %p1978_p12  ;;  %s1469_s11 = scalar_lea.vmem %s1468_s29, 256 }
  0xbd   : > { %474 = vmatprep.subr.bf16.mxu1 %v1323_v38  ;;  %p1470_p9 = scmp.lt.s32.totalorder %s1887_s14, %s1468_s29  ;;  %p1471_p2 = scmp.lt.s32.totalorder %s1469_s11, %s1463_s22 }
  0xbe   : > { %599 = vmatpush1.bf16.msra.mxu0 %v1283_v26  ;;  %s1885_s17 = scalar_lea.hbm %s1977_s5, %s1114_s16  ;;  %p1466_p1 = pneg %p1465_p11 }
  0xbf   : > { %600 = vmatprep.subr.bf16.mxu0 %v1284_v29  ;;  %p1472_p4 = por %p1471_p2, %p1470_p9 }
  0xc0   : > { %475 = vmatpush1.bf16.msra.mxu1 %v1325_v41 }
  0xc1   : > { %476 = vmatprep.subr.bf16.mxu1 %v1329_v44  ;;  %p1473_p8 = pnand %p1472_p4, %p1466_p1 }
  0xc2   : > { %601 = vmatpush1.bf16.msra.mxu0 %v1288_v30 }
  0xc3   : > { %728 = vmatprep.subr.bf16.mxu0 %v1292_v34 }
  0xc4   : > { %477 = vmatpush1.bf16.msra.mxu1 %v1331_v47 }
  0xc5   : > { %619 = vmatmul.mubr.bf16.vlgmr.msra.gmra.mrb[0].mxu0 %v504_v35  ;;  %1126 = vmatprep.subr.bf16.mxu1 %v1584_v1 }
  0xc6   : > { %729 = vmatpush1.bf16.msra.mxu0 %v1290_v37  ;;  %760 = vmatprep.mubr.bf16.mxu0 %v1583_v0  ;;  %v1335_v0 = vld [vmem:[#allocation9] sm:$0xff]  }
  0xc7   : > { %730 = vmatprep.subr.bf16.mxu0 %v1298_v39  ;;  %495 = vmatmul.mubr.bf16.vlgmr.msra.gmra.mrb[0].mxu1 %v380_v52 }
  0xc8   : > { %1127 = vmatpush3.bf16.msra.mxu1 %v1335_v0  ;;  %1142 = vmatprep.mubr.msk.bf16.mxu1 %vm1585_vm0, %v1584_v1 }
  0xc9   : > { %1128 = vmatprep.subr.bf16.mxu1 %v1584_v1 }
  0xca   : > { %731 = vmatpush1.bf16.msra.mxu0 %v1296_v40 }
  0xcb   : > { %732 = vmatprep.subr.bf16.mxu0 %v1304_v43 }
  0xcc   : > { %1129 = vmatpush3.bf16.msra.mxu1 %v1336_v2 }
  0xcd   : > { %1130 = vmatprep.subr.bf16.mxu1 %v1584_v1 }
  0xce   : > { %733 = vmatpush1.bf16.msra.mxu0 %v1302_v50 }
  0xcf   : > { %734 = vmatprep.subr.bf16.mxu0 %v1310_v51 }
  0xd0   : > { %1131 = vmatpush3.bf16.msra.mxu1 %v1337_v3 }
  0xd1   : > { %1132 = vmatprep.subr.bf16.mxu1 %v1584_v1 }
  0xd2   : > { %735 = vmatpush1.bf16.msra.mxu0 %v1308_v53 }
  0xd3   : > { %736 = vmatprep.subr.bf16.mxu0 %v1316_v54 }
  0xd4   : > { %1133 = vmatpush3.bf16.msra.mxu1 %v1338_v4 }
  0xd5   : > { %1134 = vmatprep.subr.bf16.mxu1 %v1584_v1 }
  0xd6   : > { %737 = vmatpush1.bf16.msra.mxu0 %v1314_v55 }
  0xd7   : > { %738 = vmatprep.subr.bf16.mxu0 %v1322_v56 }
  0xd8   : > { %1135 = vmatpush3.bf16.msra.mxu1 %v1339_v5 }
  0xd9   : > { %1136 = vmatprep.subr.bf16.mxu1 %v1584_v1 }
  0xda   : > { %739 = vmatpush1.bf16.msra.mxu0 %v1320_v57 }
  0xdb   : > { %740 = vmatprep.subr.bf16.mxu0 %v1328_v58 }
  0xdc   : > { %1137 = vmatpush3.bf16.msra.mxu1 %v1340_v6 }
  0xdd   : > { %1138 = vmatprep.subr.bf16.mxu1 %v1584_v1 }
  0xde   : > { %741 = vmatpush1.bf16.msra.mxu0 %v1326_v59 }
  0xdf   : > { %742 = vmatprep.subr.bf16.mxu0 %v1334_v60 }
  0xe0   : > { %1139 = vmatpush3.bf16.msra.mxu1 %v1341_v7 }
  0xe1   : > { %1140 = vmatprep.subr.bf16.mxu1 %v1584_v1 }
  0xe2   : > { %743 = vmatpush1.bf16.msra.mxu0 %v1332_v61 }
  0xe4   : > { %1141 = vmatpush3.bf16.msra.mxu1 %v1342_v8 }
  0xe5   : > { %761 = vmatmul.mubr.bf16.vlgmr.msra.gmra.mrb[0].mxu0 %v646_v63 }
 0x19a   : > { %v496_v9 = vpop.f32.mrb[0].mxu1 }
 0x19b   : > { %v498_v10 = vpop.f32.mrb[1].mxu1 }
 0x19c   : > { %v500_v11 = vpop.f32.mrb[2].mxu1 }
 0x19d   : > { %v501_v12 = vpop.f32.mrb[3].mxu1 }
 0x1b8   : > { %v762_v13 = vpop.f32.mrb[0].mxu0 }
 0x1b9   : > { %v1146_v14 = vadd.f32 %v762_v13, %v496_v9  ;;  %v764_v15 = vpop.f32.mrb[1].mxu0 }
 0x1ba   : > { %v1147_v16 = vadd.f32 %v764_v15, %v498_v10  ;;  %v766_v17 = vpop.f32.mrb[2].mxu0 }
 0x1bb   : > { %v767_v18 = vpop.f32.mrb[3].mxu0 }
 0x1bc   : > { %v1102_v19 = vmul.f32 -1.442695, %v1147_v16 }
 0x1be   : > { %1343 = vpow2.f32 %v1102_v19 }
 0x1c8   : > { %v1344_v20 = vpop.eup %1343 }
 0x1c9   : > { %v774_v21 = vadd.f32 1.0, %v1344_v20 }
 0x1cb   : > { %1345 = vrcp.f32 %v774_v21 }
 0x1d5   : > { %v1346_v22 = vpop.eup %1345 }
 0x1d6   : > { %v777_v23 = vmul.f32 %v1346_v22, %v1146_v14 }
 0x1d8   : > { %v778_v24 = vpack.c.bf16 %v777_v23, %v777_v23 }
 0x1da   : > { %1143 = vmatmul.mubr.bf16.vlgmr.msra.gmra.mrb[4].mxu1 %v778_v24 }
 0x2ad   : > { %v884_v26 = vpop.f32.mrb[4].mxu1 }
 0x2ae   : > { %v885_v27 = vadd.f32 %v1103_v25, %v884_v26  ;;  %v1144_v28 = vpop.f32.mrb[5].mxu1 }
 0x2af   : > { %v887_v29 = vpop.f32.mrb[6].mxu1 }
 0x2b0   : > { %890 = vst [vmem:[%s327_s9] sm:$0xff] %v885_v27  ;;  %v1145_v30 = vpop.f32.mrb[7].mxu1 }
 0x2b1   : > { %1476 = shalt.err (!%p1473_p8)
}
 0x2b2   : > { %s1477_s7 = scalar_lea.hbm %s1885_s17, 128  ;;  %s1481_s15 = scalar_lea.hbm %s1977_s5, 512 }
 0x2b3   : > { %p1478_p10 = scmp.ne.s32.totalorder %s1885_s17, %s1477_s7  ;;  %p1482_p5 = scmp.lt.u32.totalorder %s1885_s17, %s1977_s5 }
 0x2b4   : > { %p1483_p13 = scmp.lt.u32.totalorder %s1481_s15, %s1477_s7  ;;  %p1485_p7 = scmp.lt.u32.totalorder %s1477_s7, %s1885_s17 }
 0x2b5   : > { %p1479_p6 = pnand %p1478_p10, %p1978_p12 }
 0x2b6   : > { %p1484_p3 = por %p1483_p13, %p1482_p5 }
 0x2b7   : > { %p1480_p0 = pneg %p1479_p6 }
 0x2b8   : > { %p1486_p11 = por %p1485_p7, %p1484_p3 }
 0x2ba   : > { %p1487_p1 = pnand %p1486_p11, %p1480_p0 }
 0x2bc   : > { %1490 = shalt.err (!%p1487_p1)
}
 0x2bd   : > { %1164 = dma.vmem_to_hbm [thread:$0]  (%p1978_p12), %s1887_s14, 128, %s1885_s17, %s892_s21  }
 0x2be PF: > { %s1979_s28 = sld [smem:[#allocation17_spill]]  ;;  %s1980_s8 = sld [smem:[#allocation18_spill]] }
 0x2bf   : > { %p1189_p9 = scmp.ge.s32.totalorder %s1573_s25, 2 }
 0x2c4   : > { %s919_s6 = sand.u32 1, %s1979_s28   ;;  %p1981_p2 = scmp.ne.s32.totalorder %s1980_s8, 0 }
 0x2c5   : > { %s920_s16 = scalar_lea.sflag [#allocation5], %s919_s6 }
 0x2c6   : > { %p1181_p4 = pnand %p1189_p9, %p1981_p2 }
 0x2c8   : > { %1540 = dma.done.wait (!%p1181_p4), %s920_s16, 128  }
 0x2c9   : > { %1542 = vsyncadd (!%p1181_p4), %s920_s16, 4294967168  ;;  %s25_s25 = sadd.s32 1, %s1573_s25   ;;  %s1982_s10 = sld [smem:[#allocation19_spill]] }
 0x2ca   : > { %p22_p8 = scmp.ge.s32.totalorder %s25_s25, 6   ;;  %s1983_s9 = sld [smem:[#allocation20_spill]] }
 0x2cb   : > { %s1984_s18 = smov %s1549_s19  ;;  %s1985_s19 = smov %s1553_s20 }
 0x2cc   : > { %s1986_s20 = smov %s1771_s3  ;;  %s1987_s21 = smov %s1565_s23 }
 0x2cd   : > { %s1988_s22 = smov %s1569_s24  ;;  %24 = sbr.rel (!%p22_p8) target bundleno = 14 (0xe), region = 108 }
 0x2cf   : > { %s1989_s23 = smov %s1982_s10 }
 0x2d0   : > { %s1990_s24 = smov %s1983_s9 }
 0x2d4   :  { %925 = vsyncpa [#allocation4], 1 }
 0x2d5   :  { %927 = vsyncpa [#allocation4 + $0x1], 1 }
 0x2d6   :  { %928 = vsyncpa [#allocation7], 1 }
 0x2d7   :  { %930 = vsyncpa [#allocation7 + $0x1], 1 }
 0x2d8   :  { %931 = vsyncpa [#allocation10], 1 }
 0x2d9   :  { %932 = vsyncpa [#allocation5], 1 }
 0x2da   :  { %934 = vsyncpa [#allocation5 + $0x1], 1 }

</bundles_post_ra>
